<compile_context>
chip_gen: v6e
topology: v6e:2x2x1
jax: 0.10.0
libtpu: 0.0.40
codegen_flags: <defaults>
</compile_context>

<pallas_src>
import functools
import math

import jax
import jax.numpy as jnp
from jax.experimental import pallas as pl
from jax.experimental.pallas import tpu as pltpu


def _round_up(a, b):
    return (a + b - 1) // b * b


def _margin_loss_kernel(x_ref, t_ref, o_ref, *, margin, n_valid, tile_n):
    # x_ref: (TILE_N, C) logits; t_ref: (TILE_N, 1) int32; o_ref: (8, 128) f32.
    i = pl.program_id(0)
    x = x_ref[...].astype(jnp.float32)               # in-kernel cast (bf16-safe)
    t = t_ref[...]                                   # (TILE_N, 1) int32
    tn, c = x.shape

    # One-hot mask via iota compare (equivalent of scatter_(1, target, 1)).
    col = jax.lax.broadcasted_iota(jnp.int32, (tn, c), 1)
    onehot = col == t                                # (TILE_N, C) bool

    # Stable logsumexp over the RAW logits; the margin is reintroduced on
    # per-row scalars only (no full-tile select / second exp pass).
    row_max = jnp.max(x, axis=-1, keepdims=True)     # (TILE_N, 1)
    shifted = x - row_max
    sumexp_x = jnp.sum(jnp.exp(shifted), axis=-1, keepdims=True)
    x_t = jnp.sum(jnp.where(onehot, shifted, 0.0), axis=-1, keepdims=True)

    delta = math.expm1(-margin)                      # e^{-m*s} - 1, compile-time
    sumexp_out = sumexp_x + jnp.exp(x_t) * jnp.float32(delta)
    loss_per_row = jnp.log(sumexp_out) - (x_t - jnp.float32(margin))

    # Mask rows past the real batch (trailing partial block may hold garbage
    # VMEM).  This select MUST happen before the cross-row reduction.
    row_id = i * tile_n + jax.lax.broadcasted_iota(jnp.int32, (tn, 1), 0)
    partial = jnp.sum(jnp.where(row_id < n_valid, loss_per_row, 0.0))

    # Lane-dense per-tile partial sum, pre-scaled by 1/1024 (exact) so the
    # wrapper can do a contiguous full-array reduce.
    o_ref[...] = jnp.broadcast_to(partial * (1.0 / 1024.0), o_ref.shape)


def _choose_tile_n(n, c_eff, target_f32_bytes=2 * 1024 * 1024):
    """TILE_N: multiple of 8, sized against the in-kernel f32 working set."""
    rows = max(8, target_f32_bytes // max(1, c_eff * 4))
    rows = int(rows) // 8 * 8
    return max(8, min(rows, _round_up(n, 8)))


def margin_loss(x, target, m=0.2, s=10.0, tile_n=None):
    """x: (N, C) float logits, target: (N,) int class ids -> scalar f32 loss."""
    # TODO(synk): per-class `weight` (default None in the module) not implemented.
    # TODO(synk): for vocab-scale C, add a second ("arbitrary") grid axis over C
    #             with streaming logsumexp instead of one full (TILE_N, C) block.
    n, c = x.shape
    t2d = target.astype(jnp.int32).reshape(n, 1)

    # Lane-dense class axis: pad C up to 128 (tiny arrays only) with the
    # dtype's most negative finite value -> exp underflows to 0 and the padded
    # columns are never selected by the one-hot.
    c_eff = c
    if c < 128:
        c_eff = 128
        fill = jnp.finfo(x.dtype).min
        x = jnp.pad(x, ((0, 0), (0, c_eff - c)), constant_values=fill)
    # No batch-dim pad of x: Pallas's trailing partial block + in-kernel row
    # mask handle N % tile_n != 0 without duplicating x in HBM.

    itemsize = jnp.dtype(x.dtype).itemsize
    if tile_n is None:
        tile_n = _choose_tile_n(n, c_eff)
    else:
        tile_n = max(8, min(_round_up(int(tile_n), 8), _round_up(n, 8)))

    # Guarantee >= 2 grid steps when possible so the "parallel" axis actually
    # shards across both TensorCores on v7x (no effect on v5e/v6e).
    if pl.cdiv(n, tile_n) < 2 and tile_n > 8:
        tile_n = max(8, _round_up(tile_n // 2, 8))
    num_tiles = pl.cdiv(n, tile_n)

    # Scoped-VMEM budget: double-buffered inputs + lane-padded target block +
    # output + ~6 f32 tile temporaries + slop.  >= v5e's 16 MiB default,
    # capped well under v7x's 64 MiB physical VMEM.
    in_bytes = tile_n * c_eff * itemsize
    f32_bytes = tile_n * c_eff * 4
    t_bytes = tile_n * 128 * 4
    need = 2 * in_bytes + 2 * t_bytes + 6 * f32_bytes + (1 << 20)
    vmem_limit = int(min(48 << 20, max(32 << 20, need)))

    kernel = functools.partial(
        _margin_loss_kernel, margin=float(m) * float(s), n_valid=n,
        tile_n=tile_n)

    partials = pl.pallas_call(
        kernel,
        out_shape=jax.ShapeDtypeStruct((num_tiles * 8, 128), jnp.float32),
        grid=(num_tiles,),
        in_specs=[
            pl.BlockSpec((tile_n, c_eff), lambda i: (i, 0)),
            pl.BlockSpec((tile_n, 1), lambda i: (i, 0)),
        ],
        out_specs=pl.BlockSpec((8, 128), lambda i: (i, 0)),
        compiler_params=pltpu.CompilerParams(
            dimension_semantics=("parallel",),
            vmem_limit_bytes=vmem_limit),
    )(x, t2d)

    # Each tile's (8, 128) block holds partial_sum / 1024 in every lane, so a
    # contiguous full-array sum (no strided gather) recovers the total.
    return jnp.sum(partials) / jnp.float32(n)


def _reference(x, target, m=0.2, s=10.0):
    c = x.shape[-1]
    onehot = jax.nn.one_hot(target, c, dtype=bool)
    out = jnp.where(onehot, x - m * s, x)
    logp = jax.nn.log_softmax(out, axis=-1)
    return -jnp.mean(jnp.take_along_axis(logp, target[:, None], axis=-1))


if __name__ == "__main__":
    key = jax.random.PRNGKey(0)
    kx, kt = jax.random.split(key)

    # Small shapes consistent with the module (batch=8 logits over 16 classes).
    N, C = 8, 16
    x = jax.random.normal(kx, (N, C), dtype=jnp.float32)
    target = jax.random.randint(kt, (N,), 0, C, dtype=jnp.int32)

    loss = jax.block_until_ready(margin_loss(x, target, m=0.2, s=10.0))
    ref = _reference(x, target, m=0.2, s=10.0)
    assert jnp.allclose(loss, ref, atol=1e-5, rtol=1e-5), (loss, ref)

    # Tiled / unpadded-trailing-block / bf16 path: N not a multiple of TILE_N,
    # multiple "parallel" grid steps, in-kernel f32 cast.
    N2, C2 = 300, 128
    x2 = jax.random.normal(kx, (N2, C2), dtype=jnp.bfloat16)
    t2 = jax.random.randint(kt, (N2,), 0, C2, dtype=jnp.int32)
    loss2 = jax.block_until_ready(margin_loss(x2, t2, tile_n=128))
    ref2 = _reference(x2.astype(jnp.float32), t2)
    assert jnp.allclose(loss2, ref2, atol=1e-3, rtol=1e-3), (loss2, ref2)

    print("KERNEL_OK")
</pallas_src>

<mosaic_0001>
module attributes {stable_mosaic.version = 11 : i64} {
  func.func @_margin_loss_kernel(%arg0: i32, %arg1: memref<8x128xf32, #tpu.memory_space<vmem>>, %arg2: memref<8x1xi32, #tpu.memory_space<vmem>>, %arg3: memref<8x128xf32, #tpu.memory_space<vmem>>) attributes {dimension_semantics = [#tpu.dimension_semantics<parallel>], iteration_bounds = array<i64: 1>, scalar_prefetch = 0 : i64, scratch_operands = 0 : i64, tpu.core_type = #tpu.core_type<tc>, window_params = [{transform_indices = @transform_0, window_bounds = array<i64: 8, 128>}, {transform_indices = @transform_1, window_bounds = array<i64: 8, 1>}, {transform_indices = @transform_2, window_bounds = array<i64: 8, 128>}]} {
    %c0 = arith.constant 0 : index
    %c0_0 = arith.constant 0 : index
    %0 = vector.load %arg1[%c0, %c0_0] : memref<8x128xf32, #tpu.memory_space<vmem>>, vector<8x128xf32>
    %c0_1 = arith.constant 0 : index
    %c0_2 = arith.constant 0 : index
    %1 = vector.load %arg2[%c0_1, %c0_2] : memref<8x1xi32, #tpu.memory_space<vmem>>, vector<8x1xi32>
    %2 = tpu.iota {dimensions = array<i32: 1>} : vector<8x128xi32>
    %3 = vector.broadcast %1 : vector<8x1xi32> to vector<8x128xi32>
    %4 = arith.cmpi eq, %2, %3 : vector<8x128xi32>
    %cst = arith.constant dense<0xFF800000> : vector<8xf32>
    %5 = vector.multi_reduction <maximumf>, %0, %cst [1] : vector<8x128xf32> to vector<8xf32>
    %6 = vector.shape_cast %5 : vector<8xf32> to vector<8x1xf32>
    %7 = vector.broadcast %6 : vector<8x1xf32> to vector<8x128xf32>
    %8 = arith.subf %0, %7 : vector<8x128xf32>
    %9 = math.exp %8 : vector<8x128xf32>
    %cst_3 = arith.constant dense<0.000000e+00> : vector<8xf32>
    %10 = vector.multi_reduction <add>, %9, %cst_3 [1] : vector<8x128xf32> to vector<8xf32>
    %11 = vector.shape_cast %10 : vector<8xf32> to vector<8x1xf32>
    %cst_4 = arith.constant 0.000000e+00 : f32
    %12 = vector.broadcast %cst_4 : f32 to vector<8x128xf32>
    %13 = arith.select %4, %8, %12 : vector<8x128xi1>, vector<8x128xf32>
    %cst_5 = arith.constant dense<0.000000e+00> : vector<8xf32>
    %14 = vector.multi_reduction <add>, %13, %cst_5 [1] : vector<8x128xf32> to vector<8xf32>
    %15 = vector.shape_cast %14 : vector<8xf32> to vector<8x1xf32>
    %16 = math.exp %15 : vector<8x1xf32>
    %cst_6 = arith.constant -0.864664733 : f32
    %17 = vector.broadcast %cst_6 : f32 to vector<8x1xf32>
    %18 = arith.mulf %16, %17 : vector<8x1xf32>
    %19 = arith.addf %11, %18 : vector<8x1xf32>
    %20 = math.log %19 : vector<8x1xf32>
    %cst_7 = arith.constant 2.000000e+00 : f32
    %21 = vector.broadcast %cst_7 : f32 to vector<8x1xf32>
    %22 = arith.subf %15, %21 : vector<8x1xf32>
    %23 = arith.subf %20, %22 : vector<8x1xf32>
    %c8_i32 = arith.constant 8 : i32
    %24 = arith.muli %arg0, %c8_i32 : i32
    %25 = tpu.iota {dimensions = array<i32: 0>} : vector<8x1xi32>
    %26 = vector.broadcast %24 : i32 to vector<8x1xi32>
    %27 = arith.addi %26, %25 : vector<8x1xi32>
    %c8_i32_8 = arith.constant 8 : i32
    %28 = vector.broadcast %c8_i32_8 : i32 to vector<8x1xi32>
    %29 = arith.cmpi slt, %27, %28 : vector<8x1xi32>
    %cst_9 = arith.constant 0.000000e+00 : f32
    %30 = vector.broadcast %cst_9 : f32 to vector<8x1xf32>
    %31 = arith.select %29, %23, %30 : vector<8x1xi1>, vector<8x1xf32>
    %32 = vector.shape_cast %31 : vector<8x1xf32> to vector<1x8x1xf32>
    %cst_10 = arith.constant dense<0.000000e+00> : vector<1xf32>
    %33 = vector.multi_reduction <add>, %32, %cst_10 [1, 2] : vector<1x8x1xf32> to vector<1xf32>
    %34 = vector.shape_cast %33 : vector<1xf32> to vector<1x1x1xf32>
    %35 = vector.extract %34[0, 0, 0] : f32 from vector<1x1x1xf32>
    %cst_11 = arith.constant 9.765625E-4 : f32
    %36 = arith.mulf %35, %cst_11 : f32
    %37 = vector.broadcast %36 : f32 to vector<8x128xf32>
    %c0_12 = arith.constant 0 : index
    %c0_13 = arith.constant 0 : index
    %38 = vector.load %arg3[%c0_12, %c0_13] : memref<8x128xf32, #tpu.memory_space<vmem>>, vector<8x128xf32>
    tpu.vector_store %arg3[%c0_12, %c0_13], %37 {strides = array<i32>} : memref<8x128xf32, #tpu.memory_space<vmem>>, vector<8x128xf32>,
    return
  }
  func.func @transform_0(%arg0: i32) -> (i32, i32) {
    %c0_i32 = arith.constant 0 : i32
    %c0_i32_0 = arith.constant 0 : i32
    return %arg0, %c0_i32 : i32, i32
  }
  func.func @transform_1(%arg0: i32) -> (i32, i32) {
    %c0_i32 = arith.constant 0 : i32
    %c0_i32_0 = arith.constant 0 : i32
    return %arg0, %c0_i32 : i32, i32
  }
  func.func @transform_2(%arg0: i32) -> (i32, i32) {
    %c0_i32 = arith.constant 0 : i32
    %c0_i32_0 = arith.constant 0 : i32
    return %arg0, %c0_i32 : i32, i32
  }
}

</mosaic_0001>

<bundles_post_ra>
// kernel: tpu_custom_call.1
= control target key start
LH: loop header
LB: loop body
LE: loop exit
PB: predicated region body
PF: predicated region fallthrough
CT: control target
= control target key end

     0   :  { %s133_s0 = inlined_call_operand.vmem [shape: f32[8,128], index: 0, kind: input, shape index: {}]   ;;  %s134_s1 = inlined_call_operand.vmem [shape: s32[8,1], index: 1, kind: input, shape index: {}]   ;;  %s135_s2 = inlined_call_operand.hbm [shape: f32[8,128], index: 2, kind: output, shape index: {}]  }
   0x1   :  { %v12_v0 = vld [vmem:[%s133_s0] sm:$0xff] }
   0x2   :  { %7 = vsyncpa [#allocation3], 0  ;;  %20 = vmax.xlane.f32.xlu0 %v12_v0  ;;  %v107_v1 = vmov 0   ;;  %v13_v2 = vld [vmem:[%s134_s1] sm:$0xff]  ;;  %v14_v5 = vlaneseq  ;;  %vm45_vm1 = vcmask 7168   ;;  %s108_s0 = smov [#allocation2]  }
   0x3   :  { %78 = vset.pattern.permute.xlu0 %v107_v1  ;;  %s65_s1 = sshll.u32 %s108_s0, 4  ;;  %s66_s1 = int_to_ptr.vmem [resolvable:$true] %s65_s1 }
   0x4   :  { %v15_v7 = vand.u32 127, %v14_v5  ;;  %s85_s15 = scalar_lea.vmem %s66_s1, 128  ;;  %p90_p1 = scmp.lt.s32.totalorder %s66_s1, %s66_s1 }
   0x5   :  { %p86_p0 = scmp.ne.s32.totalorder %s66_s1, %s85_s15  ;;  %p91_p2 = scmp.lt.s32.totalorder %s85_s15, %s85_s15 }
   0x7   :  { %p92_p3 = por %p91_p2, %p90_p1 }
   0x9   :  { %p93_p4 = pnand %p92_p3, %p86_p0 }
  0x18   :  { %17 = vperm.xlu0 %78, %v13_v2  }
  0x8b   :  { %v21_v3 = vpop.xlane.xlu0 %20 }
  0x8c   :  { %v22_v4 = vsub.f32 %v12_v0, %v21_v3 }
  0x8e   :  { %v23_v6 = vmul.f32 1.442695, %v22_v4 }
  0x90   :  { %79 = vpow2.f32 %v23_v6 }
  0x93   :  { %v18_v8 = vpop.permute.xlu0 %17 }
  0x94   :  { %vm19_vm0 = vcmp.eq.s32.totalorder %v15_v7, %v18_v8 }
  0x95   :  { %v27_v9 = vsel %vm19_vm0, %v22_v4, 0.0 }
  0x96   :  { %28 = vadd.xlane.f32.xlu1 %v27_v9 }
  0x9d   :  { %v80_v10 = vpop.eup %79 }
  0x9e   :  { %25 = vadd.xlane.f32.xlu1 %v80_v10 }
 0x11f   :  { %v29_v11 = vpop.xlane.xlu1 %28 }
 0x120   :  { %v30_v12 = vmul.f32 1.442695, %v29_v11  ;;  %v73_v18 = vadd.f32 -2.0, %v29_v11 }
 0x122   :  { %81 = vpow2.f32 %v30_v12 }
 0x127   :  { %v26_v15 = vpop.xlane.xlu1 %25 }
 0x12f   :  { %v82_v13 = vpop.eup %81 }
 0x130   :  { %v32_v14 = vmul.f32 -0.86466473, %v82_v13 }
 0x132   :  { %v33_v16 = vadd.f32 %v32_v14, %v26_v15 }
 0x134   :  { %83 = vlog2.f32 %v33_v16 }
 0x141   :  { %v84_v17 = vpop.eup %83 }
 0x142   :  { %v35_v19 = vmul.f32 0.6931472, %v84_v17 }
 0x144   :  { %v37_v20 = vsub.f32 %v35_v19, %v73_v18 }
 0x146   :  { %v46_v21 = vsel %vm45_vm1, %v37_v20, 0.0 }
 0x147   :  { %47 = vadd.xlane.f32.xlu1 %v46_v21 }
 0x1d0   :  { %v48_v22 = vpop.xlane.xlu1 %47 }
 0x1d1   :  { %v49_v23 = vrot.slane %v48_v22, 4 }
 0x1d3   :  { %v50_v24 = vadd.f32 %v49_v23, %v48_v22 }
 0x1d5   :  { %v51_v25 = vrot.slane %v50_v24, 2 }
 0x1d7   :  { %v52_v26 = vadd.f32 %v51_v25, %v50_v24 }
 0x1d9   :  { %v53_v27 = vrot.slane %v52_v26, 1 }
 0x1db   :  { %v54_v28 = vadd.f32 %v53_v27, %v52_v26 }
 0x1dd   :  { %74 = vpush %v54_v28 }
 0x20e   :  { %s75_s13 = spop %74 }
 0x20f   :  { %s56_s14 = smul.f32 0.0009765625, %s75_s13 }
 0x211   :  { %v57_v29 = vstv %s56_s14 }
 0x212   :  { %58 = vst [vmem:[#allocation2] sm:$0xff] %v57_v29 }
 0x213   :  { %96 = shalt.err (!%p93_p4)
}
 0x214   :  { %68 = dma.vmem_to_hbm [thread:$0]  %s66_s1, 128, %s135_s2, [#allocation3]  }
 0x215   :  { %105 = dma.done.wait [#allocation3], 128  }
 0x216   :  { %106 = vsyncadd [#allocation3], 4294967168 }
 0x217   :  { %72 = vsyncpa [#allocation3], 1 }

</bundles_post_ra>
